<compile_context>
chip_gen: v6e
topology: v6e:2x2x1
jax: 0.10.0
libtpu: 0.0.40
codegen_flags: <defaults>
</compile_context>

<pallas_src>
import jax
import jax.numpy as jnp
from jax.experimental import pallas as pl
from jax.experimental.pallas import tpu as pltpu

_LANE = 128


def _scaler_kernel(x_ref, a_ref, b_ref, o_ref):
    # x_ref / o_ref: (row_tile, L); a_ref / b_ref: (1, L) float32.
    # y = (x - a - b/2) / (b/2)  ==  x * (2/b) - (a*(2/b) + 1)
    inv = 2.0 * pl.reciprocal(b_ref[...], approx=False)   # (1, L), once per tile
    c = a_ref[...] * inv + 1.0                             # (1, L), once per tile
    x = x_ref[...].astype(jnp.float32)
    o_ref[...] = (x * inv - c).astype(o_ref.dtype)


def _tile_bytes_for_chip():
    # v7x HBM (~3.2 TB/s per TC) needs bigger steps to hide the ~0.35 us/step
    # grid overhead; ~2 MiB tiles already saturate v5e/v6e bandwidth.
    try:
        kind = jax.devices()[0].device_kind.lower()
    except Exception:
        kind = ""
    return (4 << 20) if "v7" in kind else (2 << 20)


def half_minmax_half_nothing_scaler(x, a, b, *, tile_bytes=None):
    """Apply (x - a - b/2) / (b/2) row-wise.  x: (N, D), a/b: (D,)."""
    N, D = x.shape
    out_dtype = x.dtype
    if N == 0:
        return jnp.zeros((0, D), out_dtype)
    a = a.astype(jnp.float32)
    b = b.astype(jnp.float32)
    itemsize = jnp.dtype(out_dtype).itemsize

    # ---- feature-axis layout -------------------------------------------------
    reps, n_fold_pad, d_pad = 1, 0, 0
    if D % _LANE == 0:
        Dl = D
        x2, rows = x, N
    elif _LANE % D == 0:
        # Tiny D dividing 128: fold `reps` logical rows into one lane-dense
        # 128-wide physical row (free row-major reshape); tile a/b to match.
        reps = _LANE // D
        Dl = _LANE
        n_fold_pad = (-N) % reps
        # TODO(synk): the rare N % reps != 0 case costs one extra pad pass; it
        # could be removed by handling the <reps tail rows outside the fold.
        x2 = jnp.pad(x, ((0, n_fold_pad), (0, 0))) if n_fold_pad else x
        rows = (N + n_fold_pad) // reps
        x2 = x2.reshape(rows, Dl)
        a = jnp.tile(a, reps)
        b = jnp.tile(b, reps)
    elif D > _LANE:
        # Moderate/large non-multiple D: keep the full feature extent as the
        # last block dim (legal per the (8,128) rule).  Only the final partial
        # 128-lane chunk per row is a masked store -- much cheaper than the two
        # extra HBM passes a pad + slice would cost on this memory-bound op.
        Dl = D
        x2, rows = x, N
    else:
        # Tiny D that does not divide 128 (e.g. 48, 96): pad to one vreg lane
        # width with identity scaling so stores stay lane-dense.
        d_pad = _LANE - D
        Dl = _LANE
        x2 = jnp.pad(x, ((0, 0), (0, d_pad)))
        a = jnp.pad(a, (0, d_pad))
        b = jnp.pad(b, (0, d_pad), constant_values=1.0)
        rows = N

    a2 = a.reshape(1, Dl)
    b2 = b.reshape(1, Dl)

    # ---- row tiling: ragged grid, NO row padding -----------------------------
    if tile_bytes is None:
        tile_bytes = _tile_bytes_for_chip()
    # Align to the dtype's sublane packing: 8 rows f32, 16 bf16, 32 int8/fp8.
    align = max(8, 32 // itemsize)
    row_tile = max(align, (tile_bytes // (Dl * itemsize) // align) * align)
    if row_tile >= rows:
        if rows >= 2 * align:
            # Keep >=2 grid steps so the "parallel" row axis can shard across
            # both TensorCores on v7x.
            row_tile = pl.cdiv(pl.cdiv(rows, 2), align) * align
        else:
            row_tile = rows  # block == full row extent (always legal)
    grid = (pl.cdiv(rows, row_tile),)

    out2 = pl.pallas_call(
        _scaler_kernel,
        out_shape=jax.ShapeDtypeStruct((rows, Dl), out_dtype),
        grid_spec=pltpu.PrefetchScalarGridSpec(
            num_scalar_prefetch=0,
            grid=grid,
            in_specs=[
                pl.BlockSpec((row_tile, Dl), lambda i: (i, 0)),  # X tile
                pl.BlockSpec((1, Dl), lambda i: (0, 0)),         # a (resident)
                pl.BlockSpec((1, Dl), lambda i: (0, 0)),         # b (resident)
            ],
            out_specs=pl.BlockSpec((row_tile, Dl), lambda i: (i, 0)),
        ),
        compiler_params=pltpu.CompilerParams(
            dimension_semantics=("parallel",),
            vmem_limit_bytes=32 << 20,
        ),
    )(x2, a2, b2)

    # ---- undo layout ----------------------------------------------------------
    if reps > 1:
        out = out2.reshape(rows * reps, D)
        return out[:N] if n_fold_pad else out
    if d_pad:
        return out2[:, :D]
    return out2


def _fit_buffers(x_train, dim):
    """Stand-in for HalfMinMaxHalfNothingScaler.fit() (host-side reduction)."""
    # TODO(synk): fit() is a training-time numpy reduction; kept outside the kernel.
    half = dim // 2
    xmin = jnp.min(x_train[:, :half], axis=0)
    xmax = jnp.max(x_train[:, :half], axis=0)
    a = jnp.concatenate([xmin, jnp.zeros(dim - half, jnp.float32)])
    b = jnp.concatenate([xmax - xmin, jnp.ones(dim - half, jnp.float32)])
    return a, b


if __name__ == "__main__":
    key = jax.random.PRNGKey(0)
    k1, k2 = jax.random.split(key)

    N, DIM = 8, 32                          # small shapes: batch=8, dim=32
    x_train = jax.random.uniform(k1, (16, DIM), jnp.float32, 1.0, 5.0)
    x = jax.random.uniform(k2, (N, DIM), jnp.float32, 1.0, 5.0)

    a, b = _fit_buffers(x_train, DIM)       # buffers per the module's fit()

    out = half_minmax_half_nothing_scaler(x, a, b)
    out = jax.block_until_ready(out)

    # Reference check in plain JAX (same formula as PyTorch transform()).
    ref = (x - a[None, :] - b[None, :] / 2.0) / (b[None, :] / 2.0)
    assert out.shape == (N, DIM) and out.dtype == jnp.float32
    assert jnp.allclose(out, ref, rtol=1e-5, atol=1e-5)

    print("KERNEL_OK")
</pallas_src>

<mosaic_0001>
module attributes {stable_mosaic.version = 11 : i64} {
  func.func @_scaler_kernel(%arg0: i32, %arg1: memref<2x128xf32, #tpu.memory_space<vmem>>, %arg2: memref<1x128xf32, #tpu.memory_space<vmem>>, %arg3: memref<1x128xf32, #tpu.memory_space<vmem>>, %arg4: memref<2x128xf32, #tpu.memory_space<vmem>>) attributes {dimension_semantics = [#tpu.dimension_semantics<parallel>], iteration_bounds = array<i64: 1>, scalar_prefetch = 0 : i64, scratch_operands = 0 : i64, tpu.core_type = #tpu.core_type<tc>, window_params = [{transform_indices = @transform_0, window_bounds = array<i64: 2, 128>}, {pipeline_mode = #tpu.pipeline_mode<synchronous>, transform_indices = @transform_1, window_bounds = array<i64: 1, 128>}, {pipeline_mode = #tpu.pipeline_mode<synchronous>, transform_indices = @transform_2, window_bounds = array<i64: 1, 128>}, {transform_indices = @transform_3, window_bounds = array<i64: 2, 128>}]} {
    %c0 = arith.constant 0 : index
    %c0_0 = arith.constant 0 : index
    %0 = vector.load %arg3[%c0, %c0_0] : memref<1x128xf32, #tpu.memory_space<vmem>>, vector<1x128xf32>
    %1 = tpu.reciprocal %0 : vector<1x128xf32> -> vector<1x128xf32>
    %cst = arith.constant 2.000000e+00 : f32
    %2 = vector.broadcast %cst : f32 to vector<1x128xf32>
    %3 = arith.mulf %2, %1 : vector<1x128xf32>
    %c0_1 = arith.constant 0 : index
    %c0_2 = arith.constant 0 : index
    %4 = vector.load %arg2[%c0_1, %c0_2] : memref<1x128xf32, #tpu.memory_space<vmem>>, vector<1x128xf32>
    %5 = arith.mulf %4, %3 : vector<1x128xf32>
    %cst_3 = arith.constant 1.000000e+00 : f32
    %6 = vector.broadcast %cst_3 : f32 to vector<1x128xf32>
    %7 = arith.addf %5, %6 : vector<1x128xf32>
    %c0_4 = arith.constant 0 : index
    %c0_5 = arith.constant 0 : index
    %8 = vector.load %arg1[%c0_4, %c0_5] : memref<2x128xf32, #tpu.memory_space<vmem>>, vector<2x128xf32>
    %9 = vector.broadcast %3 : vector<1x128xf32> to vector<2x128xf32>
    %10 = arith.mulf %8, %9 : vector<2x128xf32>
    %11 = vector.broadcast %7 : vector<1x128xf32> to vector<2x128xf32>
    %12 = arith.subf %10, %11 : vector<2x128xf32>
    %c0_6 = arith.constant 0 : index
    %c0_7 = arith.constant 0 : index
    %13 = vector.load %arg4[%c0_6, %c0_7] : memref<2x128xf32, #tpu.memory_space<vmem>>, vector<2x128xf32>
    tpu.vector_store %arg4[%c0_6, %c0_7], %12 {strides = array<i32>} : memref<2x128xf32, #tpu.memory_space<vmem>>, vector<2x128xf32>,
    return
  }
  func.func @transform_0(%arg0: i32) -> (i32, i32) {
    %c0_i32 = arith.constant 0 : i32
    %c0_i32_0 = arith.constant 0 : i32
    return %arg0, %c0_i32 : i32, i32
  }
  func.func @transform_1(%arg0: i32) -> (i32, i32) {
    %c0_i32 = arith.constant 0 : i32
    %c0_i32_0 = arith.constant 0 : i32
    %c0_i32_1 = arith.constant 0 : i32
    return %c0_i32, %c0_i32_0 : i32, i32
  }
  func.func @transform_2(%arg0: i32) -> (i32, i32) {
    %c0_i32 = arith.constant 0 : i32
    %c0_i32_0 = arith.constant 0 : i32
    %c0_i32_1 = arith.constant 0 : i32
    return %c0_i32, %c0_i32_0 : i32, i32
  }
  func.func @transform_3(%arg0: i32) -> (i32, i32) {
    %c0_i32 = arith.constant 0 : i32
    %c0_i32_0 = arith.constant 0 : i32
    return %arg0, %c0_i32 : i32, i32
  }
}

</mosaic_0001>

<bundles_post_ra>
// kernel: tpu_custom_call.1
= control target key start
LH: loop header
LB: loop body
LE: loop exit
PB: predicated region body
PF: predicated region fallthrough
CT: control target
= control target key end

     0   :  { %8 = vsyncpa [#allocation3], 0  ;;  %s146_s0 = inlined_call_operand.hbm [shape: f32[2,128], index: 0, kind: input, shape index: {}]   ;;  %s147_s1 = inlined_call_operand.vmem [shape: f32[1,128], index: 1, kind: input, shape index: {}]   ;;  %s148_s2 = inlined_call_operand.vmem [shape: f32[1,128], index: 2, kind: input, shape index: {}]   ;;  %s149_s3 = inlined_call_operand.hbm [shape: f32[2,128], index: 3, kind: output, shape index: {}]  }
   0x1   :  { %9 = vsyncpa [#allocation4], 0  ;;  %s112_s12 = smov [#allocation2]  }
   0x2   :  { %s16_s13 = sshll.u32 %s112_s12, 4  ;;  %s17_s13 = int_to_ptr.vmem [resolvable:$true] %s16_s13 }
   0x3   :  { %s76_s14 = scalar_lea.vmem %s17_s13, 32  ;;  %p81_p1 = scmp.lt.s32.totalorder %s17_s13, %s17_s13 }
   0x4   :  { %p77_p0 = scmp.ne.s32.totalorder %s17_s13, %s76_s14  ;;  %p82_p2 = scmp.lt.s32.totalorder %s76_s14, %s76_s14 }
   0x6   :  { %p83_p3 = por %p82_p2, %p81_p1 }
   0x8   :  { %p84_p4 = pnand %p83_p3, %p77_p0 }
   0xa   :  { %87 = shalt.err (!%p84_p4)
}
   0xb   :  { %19 = dma.hbm_to_vmem [thread:$0]  %s146_s0, 32, %s17_s13, [#allocation3]  }
   0xc   :  { %108 = dma.done.wait [#allocation3], 32  }
   0xd   :  { %109 = vsyncadd [#allocation3], 4294967264  ;;  %v27_v0 = vld [vmem:[%s148_s2] sm:$0x1]  ;;  %v35_v1 = vlaneseq  ;;  %s113_s0 = smov [#allocation5]  }
   0xe   :  { %66 = vrcp.f32 %v27_v0  ;;  %v30_v5 = vld [vmem:[%s147_s1] sm:$0x1]  ;;  %s55_s21 = sshll.u32 %s113_s0, 4  ;;  %s56_s21 = int_to_ptr.vmem [resolvable:$true] %s55_s21 }
   0xf   :  { %v36_v2 = vshrl.u32 %v35_v1, 7  ;;  %v33_v7 = vld [vmem:[#allocation2] sm:$0x3]  ;;  %s88_s2 = scalar_lea.vmem %s56_s21, 32  ;;  %p93_p6 = scmp.lt.s32.totalorder %s56_s21, %s56_s21 }
  0x10   :  { %p89_p5 = scmp.ne.s32.totalorder %s56_s21, %s88_s2  ;;  %p94_p7 = scmp.lt.s32.totalorder %s88_s2, %s88_s2 }
  0x11   :  { %v37_v3 = vsub.s32 0, %v36_v2 }
  0x12   :  { %p95_p8 = por %p94_p7, %p93_p6 }
  0x14   :  { %p96_p9 = pnand %p95_p8, %p89_p5 }
  0x1b   :  { %v67_v4 = vpop.eup %66 }
  0x1c   :  { %v29_v6 = vmul.f32 2.0, %v67_v4 }
  0x1e   :  { %v31_v8 = vmul.f32 %v30_v5, %v29_v6  ;;  %v38_v9 = vrot.slane %v29_v6, %v37_v3 }
  0x20   :  { %v32_v10 = vadd.f32 1.0, %v31_v8  ;;  %v40_v11 = vmul.f32 %v38_v9, %v33_v7 }
  0x22   :  { %v45_v12 = vrot.slane %v32_v10, %v37_v3 }
  0x24   :  { %v47_v13 = vsub.f32 %v40_v11, %v45_v12 }
  0x26   :  { %48 = vst [vmem:[#allocation5] sm:$0x3] %v47_v13 }
  0x27   :  { %99 = shalt.err (!%p96_p9)
}
  0x28   :  { %58 = dma.vmem_to_hbm [thread:$0]  %s56_s21, 32, %s149_s3, [#allocation4]  }
  0x29   :  { %110 = dma.done.wait [#allocation4], 32  }
  0x2a   :  { %111 = vsyncadd [#allocation4], 4294967264 }
  0x2b   :  { %62 = vsyncpa [#allocation3], 1 }
  0x2c   :  { %63 = vsyncpa [#allocation4], 1 }

</bundles_post_ra>
